<compile_context>
chip_gen: v5e
topology: v5e:2x2
jax: 0.10.0
libtpu: 0.0.40
codegen_flags: <defaults>
</compile_context>

<pallas_src>
import functools

import jax
import jax.numpy as jnp
from jax.experimental import pallas as pl
from jax.experimental.pallas import tpu as pltpu

LANE = 128              # lane width (last dim)
MAX_BLOCK_ROWS = 8192   # (8192, 128) f32 = 4 MiB per input per block
SMOOTH = 1.0            # matches forward(..., smooth=1) default


def _dice_partial_kernel(x_ref, t_ref, o_ref, *, valid_rows, block_rows):
    """Per-block partial sums of (sigmoid(x)*t, sigmoid(x), t) over block rows."""

    def partial_sums(mask_rows):
        xf = x_ref[...].astype(jnp.float32)
        tf = t_ref[...].astype(jnp.float32)
        # sigmoid = 1 / (1 + exp(-x)): exp stays on the EUP slot, reciprocal
        # avoids the ~10-op f32 divide expansion on the VPU.
        s = pl.reciprocal(1.0 + jnp.exp(-xf), approx=False)

        if mask_rows:
            # Only ever emitted/executed for the final (ragged) grid block:
            # mask out-of-range rows so unspecified padded data contributes 0.
            row0 = pl.program_id(0) * block_rows
            rid = jax.lax.broadcasted_iota(jnp.int32, (block_rows, LANE), 0) + row0
            valid = rid < valid_rows
            s = jnp.where(valid, s, 0.0)
            tf = jnp.where(valid, tf, 0.0)

        # Row-axis (sublane) reductions: vreg-wise VPU adds + one sublane fold
        # per sum; output stays lane-dense (128).  Single store per step.
        o_ref[0] = jnp.stack(
            [jnp.sum(s * tf, axis=0),   # intersection partial
             jnp.sum(s, axis=0),        # sum(sigmoid(inputs)) partial
             jnp.sum(tf, axis=0)],      # sum(targets) partial
            axis=0)

    if valid_rows % block_rows == 0:
        # Grid divides evenly: no mask code is emitted at all.
        partial_sums(False)
    else:
        last = pl.num_programs(0) - 1

        @pl.when(pl.program_id(0) != last)
        def _():
            partial_sums(False)

        @pl.when(pl.program_id(0) == last)
        def _():
            partial_sums(True)


def _row_align(dtype):
    """Rows per native sublane tile for this dtype (f32: 8, bf16: 16, i8: 32)."""
    return 8 * max(1, 4 // dtype.itemsize)


def dice_loss(inputs, targets, smooth=SMOOTH):
    """Pallas implementation of DiceLoss.forward(inputs, targets, smooth=1)."""
    x = inputs.reshape(-1)
    t = targets.reshape(-1)
    n = x.shape[0]

    # Rows handled by the kernel: a multiple of the sublane tile of both input
    # dtypes, so in-array tiles are always whole.  The remaining tail
    # (< row_align*128 elements) is folded in below with plain JAX.
    row_align = max(_row_align(x.dtype), _row_align(t.dtype))
    kern_rows = (n // (row_align * LANE)) * row_align
    kern_elems = kern_rows * LANE

    sums = jnp.zeros((3,), jnp.float32)

    if kern_rows > 0:
        block_rows = min(MAX_BLOCK_ROWS, kern_rows)
        n_blocks = pl.cdiv(kern_rows, block_rows)

        x2 = x[:kern_elems].reshape(kern_rows, LANE)   # native dtype, zero-copy
        t2 = t[:kern_elems].reshape(kern_rows, LANE)

        kernel = functools.partial(
            _dice_partial_kernel,
            valid_rows=kern_rows,
            block_rows=block_rows,
        )

        bytes_accessed = (kern_elems * (x2.dtype.itemsize + t2.dtype.itemsize)
                          + n_blocks * 3 * LANE * 4)

        partials = pl.pallas_call(
            kernel,
            out_shape=jax.ShapeDtypeStruct((n_blocks, 3, LANE), jnp.float32),
            grid=(n_blocks,),
            in_specs=[
                pl.BlockSpec((block_rows, LANE), lambda i: (i, 0)),
                pl.BlockSpec((block_rows, LANE), lambda i: (i, 0)),
            ],
            out_specs=pl.BlockSpec((1, 3, LANE), lambda i: (i, 0, 0)),
            compiler_params=pltpu.CompilerParams(
                dimension_semantics=("parallel",),
                vmem_limit_bytes=32 << 20),
            cost_estimate=pl.CostEstimate(
                flops=4 * kern_elems,
                transcendentals=kern_elems,
                bytes_accessed=bytes_accessed),
        )(x2, t2)

        sums = sums + jnp.sum(partials, axis=(0, 2))

    if kern_elems < n:
        # Ragged tail (< row_align*128 elements): negligible work, plain JAX.
        xt = jax.nn.sigmoid(x[kern_elems:].astype(jnp.float32))
        tt = t[kern_elems:].astype(jnp.float32)
        sums = sums + jnp.stack([jnp.sum(xt * tt), jnp.sum(xt), jnp.sum(tt)])

    intersection, x_sum, t_sum = sums[0], sums[1], sums[2]
    dice = (2.0 * intersection + smooth) / (x_sum + t_sum + smooth)
    return 1.0 - dice


def _dice_loss_ref(inputs, targets, smooth=SMOOTH):
    x = jax.nn.sigmoid(inputs.astype(jnp.float32)).reshape(-1)
    t = targets.astype(jnp.float32).reshape(-1)
    inter = jnp.sum(x * t)
    dice = (2.0 * inter + smooth) / (jnp.sum(x) + jnp.sum(t) + smooth)
    return 1.0 - dice


if __name__ == "__main__":
    key = jax.random.PRNGKey(0)
    k1, k2 = jax.random.split(key)
    # NCHW, consistent with a segmentation-logit input to DiceLoss.
    inputs = jax.random.normal(k1, (2, 4, 16, 16), dtype=jnp.float32)
    targets = (jax.random.uniform(k2, (2, 4, 16, 16)) > 0.5).astype(jnp.float32)

    out = dice_loss(inputs, targets)
    jax.block_until_ready(out)

    ref = _dice_loss_ref(inputs, targets)
    assert jnp.allclose(out, ref, atol=1e-5, rtol=1e-5), (out, ref)
    print("KERNEL_OK")
</pallas_src>

<mosaic_0001>
module attributes {stable_mosaic.version = 11 : i64} {
  func.func @_dice_partial_kernel(%arg0: i32, %arg1: memref<16x128xf32, #tpu.memory_space<vmem>>, %arg2: memref<16x128xf32, #tpu.memory_space<vmem>>, %arg3: memref<1x3x128xf32, #tpu.memory_space<vmem>>) attributes {dimension_semantics = [#tpu.dimension_semantics<parallel>], iteration_bounds = array<i64: 1>, scalar_prefetch = 0 : i64, scratch_operands = 0 : i64, tpu.core_type = #tpu.core_type<tc>, window_params = [{transform_indices = @transform_0, window_bounds = array<i64: 16, 128>}, {transform_indices = @transform_1, window_bounds = array<i64: 16, 128>}, {transform_indices = @transform_2, window_bounds = array<i64: 1, 3, 128>}]} {
    %c0 = arith.constant 0 : index
    %c0_0 = arith.constant 0 : index
    %0 = vector.load %arg1[%c0, %c0_0] : memref<16x128xf32, #tpu.memory_space<vmem>>, vector<16x128xf32>
    %c0_1 = arith.constant 0 : index
    %c0_2 = arith.constant 0 : index
    %1 = vector.load %arg2[%c0_1, %c0_2] : memref<16x128xf32, #tpu.memory_space<vmem>>, vector<16x128xf32>
    %cst = arith.constant 0.000000e+00 : f32
    %2 = vector.broadcast %cst : f32 to vector<16x128xf32>
    %3 = arith.subf %2, %0 : vector<16x128xf32>
    %4 = math.exp %3 : vector<16x128xf32>
    %cst_3 = arith.constant 1.000000e+00 : f32
    %5 = vector.broadcast %cst_3 : f32 to vector<16x128xf32>
    %6 = arith.addf %5, %4 : vector<16x128xf32>
    %7 = tpu.reciprocal %6 : vector<16x128xf32> -> vector<16x128xf32>
    %8 = arith.mulf %7, %1 : vector<16x128xf32>
    %cst_4 = arith.constant dense<0.000000e+00> : vector<128xf32>
    %9 = vector.multi_reduction <add>, %8, %cst_4 [0] : vector<16x128xf32> to vector<128xf32>
    %cst_5 = arith.constant dense<0.000000e+00> : vector<128xf32>
    %10 = vector.multi_reduction <add>, %7, %cst_5 [0] : vector<16x128xf32> to vector<128xf32>
    %cst_6 = arith.constant dense<0.000000e+00> : vector<128xf32>
    %11 = vector.multi_reduction <add>, %1, %cst_6 [0] : vector<16x128xf32> to vector<128xf32>
    %12 = vector.shape_cast %9 : vector<128xf32> to vector<1x128xf32>
    %13 = vector.shape_cast %10 : vector<128xf32> to vector<1x128xf32>
    %14 = vector.shape_cast %11 : vector<128xf32> to vector<1x128xf32>
    %15 = tpu.concatenate %12, %13, %14 in 0 : vector<1x128xf32>, vector<1x128xf32>, vector<1x128xf32> -> vector<3x128xf32>
    %c0_7 = arith.constant 0 : index
    %c0_8 = arith.constant 0 : index
    %c0_9 = arith.constant 0 : index
    %16 = vector.load %arg3[%c0_7, %c0_8, %c0_9] : memref<1x3x128xf32, #tpu.memory_space<vmem>>, vector<1x3x128xf32>
    %17 = vector.shape_cast %16 : vector<1x3x128xf32> to vector<3x128xf32>
    %18 = vector.shape_cast %15 : vector<3x128xf32> to vector<1x3x128xf32>
    tpu.vector_store %arg3[%c0_7, %c0_8, %c0_9], %18 {strides = array<i32>} : memref<1x3x128xf32, #tpu.memory_space<vmem>>, vector<1x3x128xf32>,
    return
  }
  func.func @transform_0(%arg0: i32) -> (i32, i32) {
    %c0_i32 = arith.constant 0 : i32
    %c0_i32_0 = arith.constant 0 : i32
    return %arg0, %c0_i32 : i32, i32
  }
  func.func @transform_1(%arg0: i32) -> (i32, i32) {
    %c0_i32 = arith.constant 0 : i32
    %c0_i32_0 = arith.constant 0 : i32
    return %arg0, %c0_i32 : i32, i32
  }
  func.func @transform_2(%arg0: i32) -> (i32, i32, i32) {
    %c0_i32 = arith.constant 0 : i32
    %c0_i32_0 = arith.constant 0 : i32
    %c0_i32_1 = arith.constant 0 : i32
    return %arg0, %c0_i32, %c0_i32_0 : i32, i32, i32
  }
}

</mosaic_0001>

<bundles_post_ra>
// kernel: tpu_custom_call.1
= control target key start
LH: loop header
LB: loop body
LE: loop exit
PB: predicated region body
PF: predicated region fallthrough
CT: control target
= control target key end

     0   :  { %7 = vsyncpa [#allocation3], 0  ;;  %s209_s0 = inlined_call_operand.hbm [shape: f32[16,128], index: 0, kind: input, shape index: {}]   ;;  %s210_s1 = inlined_call_operand.hbm [shape: f32[16,128], index: 1, kind: input, shape index: {}]   ;;  %s211_s2 = inlined_call_operand.vmem [shape: f32[1,3,128], index: 2, kind: output, shape index: {}]  }
   0x1   :  { %s13_s11 = sshll.u32 %s209_s0, 4  ;;  %s14_s11 = int_to_ptr.hbm [resolvable:$true] %s13_s11 }
   0x2   :  { %8 = vsyncpa [#allocation5], 0  ;;  %s181_s12 = smov [#allocation2]   ;;  %s26_s16 = sshll.u32 %s210_s1, 4  ;;  %s27_s16 = int_to_ptr.hbm [resolvable:$true] %s26_s16 }
   0x3   :  { %s15_s13 = sshll.u32 %s181_s12, 4  ;;  %s182_s17 = smov 128   ;;  %s16_s13 = int_to_ptr.vmem [resolvable:$true] %s15_s13 }
   0x4   :  { %s183_s18 = smov 8   ;;  %s184_s19 = smov [#allocation4]  }
   0x5   :  { %21 = dma.hbm_to_vmem [thread:$0]  %s14_s11, 256, %s16_s13, [#allocation3], %s182_s17, %s182_s17, %s183_s18  }
   0x6   :  { %s28_s20 = sshll.u32 %s184_s19, 4  ;;  %s29_s20 = int_to_ptr.vmem [resolvable:$true] %s28_s20 }
   0x7   :  { %34 = dma.hbm_to_vmem [thread:$0]  %s27_s16, 256, %s29_s20, [#allocation5], %s182_s17, %s182_s17, %s183_s18  }
   0x8   :  { %177 = dma.done.wait [#allocation3], 256  }
   0x9   :  { %178 = vsyncadd [#allocation3], 4294967040 }
   0xa   :  { %179 = dma.done.wait [#allocation5], 256  }
   0xb   :  { %180 = vsyncadd [#allocation5], 4294967040  ;;  %v43_v0 = vld [vmem:[#allocation2] sm:$0xff]  ;;  %v44_v1 = vld [vmem:[#allocation2 + $0x8] sm:$0xff]  ;;  %vm106_vm8 = vcmask 1040384   ;;  %vm108_vm9 = vcmask 1041408  }
   0xc   :  { %v47_v2 = vsub.f32 0.0, %v43_v0  ;;  %v48_v3 = vsub.f32 0.0, %v44_v1  ;;  %v45_v11 = vld [vmem:[#allocation4] sm:$0xff]  ;;  %v46_v12 = vld [vmem:[#allocation4 + $0x8] sm:$0xff] }
   0xd   :  { %v99_v15 = vadd.f32 %v46_v12, %v45_v11 }
   0xe   :  { %v49_v4 = vmul.f32 1.442695, %v47_v2  ;;  %v51_v5 = vmul.f32 1.442695, %v48_v3 }
   0xf   :  { %v100_v24 = vrot.slane %v99_v15, 4 }
  0x10   :  { %121 = vpow2.f32 %v49_v4 }
  0x11   :  { %123 = vpow2.f32 %v51_v5  ;;  %v101_v31 = vadd.f32 %v100_v24, %v99_v15 }
  0x13   :  { %v102_v38 = vrot.slane %v101_v31, 2 }
  0x15   :  { %v103_v43 = vadd.f32 %v102_v38, %v101_v31 }
  0x16   :  { %v122_v6 = vpop.eup %121 }
  0x17   :  { %v124_v7 = vpop.eup %123  ;;  %v53_v8 = vadd.f32 1.0, %v122_v6  ;;  %v104_v48 = vrot.slane %v103_v43, 1 }
  0x18   :  { %v54_v9 = vadd.f32 1.0, %v124_v7 }
  0x19   :  { %125 = vrcp.f32 %v53_v8  ;;  %vm60_vm0 = vweird.f32 %v53_v8  ;;  %v66_v16 = vand.u32 2147483648, %v53_v8  ;;  %v64_v19 = vand.u32 2147483647, %v53_v8 }
  0x1a   :  { %127 = vrcp.f32 %v54_v9  ;;  %v80_v20 = vand.u32 2147483648, %v54_v9  ;;  %vm74_vm2 = vweird.f32 %v54_v9  ;;  %v78_v22 = vand.u32 2147483647, %v54_v9 }
  0x1b   :  { %v67_v25 = vor.u32 1.1754944e-38, %v66_v16  ;;  %vm65_vm5 = vcmp.eq.f32.partialorder %v64_v19, 8.507059e+37  ;;  %v105_v53 = vadd.f32 %v104_v48, %v103_v43 }
  0x1c   :  { %v81_v28 = vor.u32 1.1754944e-38, %v80_v20  ;;  %vm79_vm7 = vcmp.eq.f32.partialorder %v78_v22, 8.507059e+37 }
  0x1f   :  { %v126_v10 = vpop.eup %125 }
  0x20   :  { %v128_v13 = vpop.eup %127  ;;  %v56_v14 = vmul.f32 %v126_v10, %v53_v8  ;;  %vm61_vm1 = vweird.f32 %v126_v10 }
  0x21   :  { %v70_v17 = vmul.f32 %v128_v13, %v54_v9  ;;  %vm75_vm3 = vweird.f32 %v128_v13  ;;  %vm62_vm4 = vmor %vm60_vm0, %vm61_vm1 }
  0x22   :  { %v57_v18 = vsub.f32 1.0, %v56_v14  ;;  %vm76_vm6 = vmor %vm74_vm2, %vm75_vm3 }
  0x23   :  { %v71_v21 = vsub.f32 1.0, %v70_v17 }
  0x24   :  { %v58_v23 = vmul.f32 %v126_v10, %v57_v18 }
  0x25   :  { %v72_v26 = vmul.f32 %v128_v13, %v71_v21 }
  0x26   :  { %v59_v27 = vadd.f32 %v126_v10, %v58_v23 }
  0x27   :  { %v73_v29 = vadd.f32 %v128_v13, %v72_v26 }
  0x28   :  { %v63_v30 = vsel %vm62_vm4, %v126_v10, %v59_v27 }
  0x29   :  { %v68_v32 = vsel %vm65_vm5, %v67_v25, %v63_v30  ;;  %v77_v33 = vsel %vm76_vm6, %v128_v13, %v73_v29 }
  0x2a   :  { %v82_v34 = vsel %vm79_vm7, %v81_v28, %v77_v33  ;;  %v83_v35 = vmul.f32 %v68_v32, %v45_v11 }
  0x2b   :  { %v84_v36 = vmul.f32 %v82_v34, %v46_v12  ;;  %v92_v37 = vadd.f32 %v82_v34, %v68_v32 }
  0x2d   :  { %v85_v39 = vadd.f32 %v84_v36, %v83_v35  ;;  %v93_v40 = vrot.slane %v92_v37, 4 }
  0x2f   :  { %v86_v41 = vrot.slane %v85_v39, 4  ;;  %v94_v42 = vadd.f32 %v93_v40, %v92_v37 }
  0x31   :  { %v87_v44 = vadd.f32 %v86_v41, %v85_v39  ;;  %v95_v45 = vrot.slane %v94_v42, 2 }
  0x33   :  { %v88_v46 = vrot.slane %v87_v44, 2  ;;  %v96_v47 = vadd.f32 %v95_v45, %v94_v42 }
  0x35   :  { %v89_v49 = vadd.f32 %v88_v46, %v87_v44  ;;  %v97_v50 = vrot.slane %v96_v47, 1 }
  0x37   :  { %v90_v51 = vrot.slane %v89_v49, 1  ;;  %v98_v52 = vadd.f32 %v97_v50, %v96_v47 }
  0x39   :  { %v91_v54 = vadd.f32 %v90_v51, %v89_v49 }
  0x3b   :  { %v107_v55 = vsel %vm106_vm8, %v91_v54, %v98_v52 }
  0x3c   :  { %v109_v56 = vsel %vm108_vm9, %v107_v55, %v105_v53 }
  0x3d   :  { %110 = vst [vmem:[%s211_s2] sm:$0x7] %v109_v56 }
  0x3e   :  { %115 = vsyncpa [#allocation3], 1 }
  0x3f   :  { %116 = vsyncpa [#allocation5], 1 }

</bundles_post_ra>
